<compile_context>
chip_gen: v7x
topology: tpu7x:2x2x1
jax: 0.10.0
libtpu: 0.0.40
codegen_flags: <defaults>
</compile_context>

<pallas_src>
import functools

import jax
import jax.numpy as jnp
from jax.experimental import pallas as pl
from jax.experimental.pallas import tpu as pltpu

# Logical (PyTorch) sizes and lane-padded (multiple-of-128) output sizes.
D_IN, H1, H2, D_OUT = 784, 300, 100, 10
H1_P, H2_P, D_OUT_P = 384, 128, 128


def _round_up(x, m):
    return (x + m - 1) // m * m


def lenet_kernel(x_ref, w1_ref, b1_ref, w2_ref, b2_ref, w3_ref, b3_ref, o_ref):
    # fc1 + ReLU : cast activations to bf16 in-kernel (VPU work hidden under the
    # matmul), f32 MXU accumulation, f32 bias/activation math.
    x = x_ref[...].astype(jnp.bfloat16)                                    # (TB, 784)
    h1 = jnp.dot(x, w1_ref[...], preferred_element_type=jnp.float32)
    h1 = jnp.maximum(h1 + b1_ref[...], 0.0).astype(jnp.bfloat16)          # (TB, 384)
    # fc2 + ReLU
    h2 = jnp.dot(h1, w2_ref[...], preferred_element_type=jnp.float32)
    h2 = jnp.maximum(h2 + b2_ref[...], 0.0).astype(jnp.bfloat16)          # (TB, 128)
    # fc3 (logits). Padded columns have zero weights/bias -> exactly zero output.
    o_ref[...] = (jnp.dot(h2, w3_ref[...], preferred_element_type=jnp.float32)
                  + b3_ref[...])                                          # (TB, 128)


def init_params(key):
    """nn.Linear-style init: U(-1/sqrt(fan_in), 1/sqrt(fan_in)).
    Weights stored (in, out) so the kernel computes x @ W + b. Unpadded f32."""
    dims = [(D_IN, H1), (H1, H2), (H2, D_OUT)]
    params = []
    for fan_in, fan_out in dims:
        key, kw, kb = jax.random.split(key, 3)
        bound = 1.0 / (fan_in ** 0.5)
        w = jax.random.uniform(kw, (fan_in, fan_out), jnp.float32, -bound, bound)
        b = jax.random.uniform(kb, (fan_out,), jnp.float32, -bound, bound)
        params += [w, b]
    return tuple(params)


def pack_params(raw_params):
    """Zero-pad output feature dims to lane multiples (K of fc1 stays 784);
    weights -> bf16, biases -> f32 (1, out). Done once, outside the hot path."""
    w1, b1, w2, b2, w3, b3 = raw_params

    def pad2(a, rows, cols):
        return jnp.pad(a, ((0, rows - a.shape[0]), (0, cols - a.shape[1])))

    return (
        pad2(w1, D_IN, H1_P).astype(jnp.bfloat16),          # (784, 384)
        pad2(b1.reshape(1, -1), 1, H1_P).astype(jnp.float32),
        pad2(w2, H1_P, H2_P).astype(jnp.bfloat16),           # (384, 128)
        pad2(b2.reshape(1, -1), 1, H2_P).astype(jnp.float32),
        pad2(w3, H2_P, D_OUT_P).astype(jnp.bfloat16),        # (128, 128)
        pad2(b3.reshape(1, -1), 1, D_OUT_P).astype(jnp.float32),
    )


@functools.partial(jax.jit, static_argnames=("block_b",))
def lenet_300_100_forward(x, packed_params, block_b=1024):
    """x: anything reshapeable to (-1, 784) (e.g. NCHW (B,1,28,28)), like torch view(-1, 784)."""
    w1, b1, w2, b2, w3, b3 = packed_params
    x2d = x.reshape(-1, D_IN).astype(jnp.float32)
    B = x2d.shape[0]

    # Batch tile: multiple of 8 sublanes, bounded VMEM for any B.
    # For B <= 2*block_b use ~ceil(B/2) so the grid has >=2 steps whenever there
    # is enough work for v7x's two TensorCores to shard the "parallel" axis.
    if B <= 2 * block_b:
        tb = max(_round_up(-(-B // 2), 8), 8)
    else:
        tb = block_b
    b_pad = _round_up(B, tb)

    # Zero-pad only the batch rows; feature dim stays 784 and f32 (cast in-kernel).
    xp = jnp.pad(x2d, ((0, b_pad - B), (0, 0)))

    tile = lambda i: (i, 0)   # batch-tiled arrays
    rep = lambda i: (0, 0)    # weights/biases: same block every step -> VMEM-resident

    flops = 2 * b_pad * (D_IN * H1_P + H1_P * H2_P + H2_P * D_OUT_P)
    bytes_accessed = (xp.size * 4                                   # f32 input
                      + (w1.size + w2.size + w3.size) * 2           # bf16 weights
                      + (b1.size + b2.size + b3.size) * 4           # f32 biases
                      + b_pad * D_OUT_P * 4)                        # f32 logits

    out = pl.pallas_call(
        lenet_kernel,
        out_shape=jax.ShapeDtypeStruct((b_pad, D_OUT_P), jnp.float32),
        grid=(b_pad // tb,),
        in_specs=[
            pl.BlockSpec((tb, D_IN), tile),       # x   (tb, 784) f32, full last dim
            pl.BlockSpec((D_IN, H1_P), rep),      # w1  (784, 384) bf16
            pl.BlockSpec((1, H1_P), rep),         # b1
            pl.BlockSpec((H1_P, H2_P), rep),      # w2
            pl.BlockSpec((1, H2_P), rep),         # b2
            pl.BlockSpec((H2_P, D_OUT_P), rep),   # w3
            pl.BlockSpec((1, D_OUT_P), rep),      # b3
        ],
        out_specs=pl.BlockSpec((tb, D_OUT_P), tile),
        compiler_params=pltpu.CompilerParams(
            # Batch tiles are independent; shards across TCs on v7x.
            # (If plain "parallel" does not core-shard on v7x, switch to
            #  pltpu.CORE_PARALLEL there.)
            dimension_semantics=("parallel",),
            # ~12-13 MB live at tb=1024: raise v5e's 16 MiB scoped default,
            # stays within v7x's 64 MiB physical VMEM.
            vmem_limit_bytes=32 * 1024 * 1024,
        ),
        cost_estimate=pl.CostEstimate(
            flops=flops, transcendentals=0, bytes_accessed=bytes_accessed),
    )(xp, w1, b1, w2, b2, w3, b3)

    return out[:B, :D_OUT]


if __name__ == "__main__":
    key = jax.random.PRNGKey(0)
    kx, kp = jax.random.split(key)

    B = 2
    x = jax.random.normal(kx, (B, 1, 28, 28), jnp.float32)   # NCHW like PyTorch MNIST
    raw_params = init_params(kp)
    packed_params = pack_params(raw_params)

    y = lenet_300_100_forward(x, packed_params)
    jax.block_until_ready(y)
    assert y.shape == (B, D_OUT)

    # Reference 1: same bf16-quantized operands, f32 accumulation, pure JAX (tight tol).
    w1, b1, w2, b2, w3, b3 = raw_params
    hp = jax.lax.Precision.HIGHEST
    xr = x.reshape(B, D_IN)
    xb = xr.astype(jnp.bfloat16).astype(jnp.float32)
    w1b = w1.astype(jnp.bfloat16).astype(jnp.float32)
    w2b = w2.astype(jnp.bfloat16).astype(jnp.float32)
    w3b = w3.astype(jnp.bfloat16).astype(jnp.float32)
    r = jnp.maximum(jnp.dot(xb, w1b, precision=hp) + b1, 0.0)
    r = jnp.maximum(jnp.dot(r.astype(jnp.bfloat16).astype(jnp.float32), w2b, precision=hp) + b2, 0.0)
    ref_bf16 = jnp.dot(r.astype(jnp.bfloat16).astype(jnp.float32), w3b, precision=hp) + b3

    # Reference 2: full-f32 PyTorch-equivalent math (loose tol for bf16 quantization).
    rf = jnp.maximum(jnp.dot(xr, w1, precision=hp) + b1, 0.0)
    rf = jnp.maximum(jnp.dot(rf, w2, precision=hp) + b2, 0.0)
    ref_f32 = jnp.dot(rf, w3, precision=hp) + b3

    assert jnp.allclose(y, ref_bf16, atol=2e-3, rtol=2e-3), float(jnp.max(jnp.abs(y - ref_bf16)))
    assert jnp.allclose(y, ref_f32, atol=5e-2, rtol=5e-2), float(jnp.max(jnp.abs(y - ref_f32)))

    print("KERNEL_OK")
</pallas_src>

<mosaic_0001>
module attributes {stable_mosaic.version = 11 : i64} {
  func.func @lenet_kernel(%arg0: i32, %arg1: memref<8x784xf32, #tpu.memory_space<vmem>>, %arg2: memref<784x384xbf16, #tpu.memory_space<vmem>>, %arg3: memref<1x384xf32, #tpu.memory_space<vmem>>, %arg4: memref<384x128xbf16, #tpu.memory_space<vmem>>, %arg5: memref<1x128xf32, #tpu.memory_space<vmem>>, %arg6: memref<128x128xbf16, #tpu.memory_space<vmem>>, %arg7: memref<1x128xf32, #tpu.memory_space<vmem>>, %arg8: memref<8x128xf32, #tpu.memory_space<vmem>>) attributes {dimension_semantics = [#tpu.dimension_semantics<parallel>], iteration_bounds = array<i64: 1>, scalar_prefetch = 0 : i64, scratch_operands = 0 : i64, tpu.core_type = #tpu.core_type<tc>, window_params = [{transform_indices = @transform_0, window_bounds = array<i64: 8, 784>}, {pipeline_mode = #tpu.pipeline_mode<synchronous>, transform_indices = @transform_1, window_bounds = array<i64: 784, 384>}, {pipeline_mode = #tpu.pipeline_mode<synchronous>, transform_indices = @transform_2, window_bounds = array<i64: 1, 384>}, {pipeline_mode = #tpu.pipeline_mode<synchronous>, transform_indices = @transform_3, window_bounds = array<i64: 384, 128>}, {pipeline_mode = #tpu.pipeline_mode<synchronous>, transform_indices = @transform_4, window_bounds = array<i64: 1, 128>}, {pipeline_mode = #tpu.pipeline_mode<synchronous>, transform_indices = @transform_5, window_bounds = array<i64: 128, 128>}, {pipeline_mode = #tpu.pipeline_mode<synchronous>, transform_indices = @transform_6, window_bounds = array<i64: 1, 128>}, {transform_indices = @transform_7, window_bounds = array<i64: 8, 128>}]} {
    %c0 = arith.constant 0 : index
    %c0_0 = arith.constant 0 : index
    %0 = vector.load %arg1[%c0, %c0_0] : memref<8x784xf32, #tpu.memory_space<vmem>>, vector<8x784xf32>
    %1 = arith.truncf %0 : vector<8x784xf32> to vector<8x784xbf16>
    %c0_1 = arith.constant 0 : index
    %c0_2 = arith.constant 0 : index
    %2 = vector.load %arg2[%c0_1, %c0_2] : memref<784x384xbf16, #tpu.memory_space<vmem>>, vector<784x384xbf16>
    %cst = arith.constant dense<0.000000e+00> : vector<8x384xf32>
    %3 = tpu.matmul %1, %2, %cst {dimension_numbers = #tpu.dot_dimension_numbers<[1], [0], [0], [1], [0, 0, 1, 1], [], []>} : vector<8x784xbf16>, vector<784x384xbf16>, vector<8x384xf32> -> vector<8x384xf32>
    %c0_3 = arith.constant 0 : index
    %c0_4 = arith.constant 0 : index
    %4 = vector.load %arg3[%c0_3, %c0_4] : memref<1x384xf32, #tpu.memory_space<vmem>>, vector<1x384xf32>
    %5 = vector.broadcast %4 : vector<1x384xf32> to vector<8x384xf32>
    %6 = arith.addf %3, %5 : vector<8x384xf32>
    %cst_5 = arith.constant 0.000000e+00 : f32
    %7 = vector.broadcast %cst_5 : f32 to vector<8x384xf32>
    %8 = arith.maximumf %6, %7 : vector<8x384xf32>
    %9 = arith.truncf %8 : vector<8x384xf32> to vector<8x384xbf16>
    %c0_6 = arith.constant 0 : index
    %c0_7 = arith.constant 0 : index
    %10 = vector.load %arg4[%c0_6, %c0_7] : memref<384x128xbf16, #tpu.memory_space<vmem>>, vector<384x128xbf16>
    %cst_8 = arith.constant dense<0.000000e+00> : vector<8x128xf32>
    %11 = tpu.matmul %9, %10, %cst_8 {dimension_numbers = #tpu.dot_dimension_numbers<[1], [0], [0], [1], [0, 0, 1, 1], [], []>} : vector<8x384xbf16>, vector<384x128xbf16>, vector<8x128xf32> -> vector<8x128xf32>
    %c0_9 = arith.constant 0 : index
    %c0_10 = arith.constant 0 : index
    %12 = vector.load %arg5[%c0_9, %c0_10] : memref<1x128xf32, #tpu.memory_space<vmem>>, vector<1x128xf32>
    %13 = vector.broadcast %12 : vector<1x128xf32> to vector<8x128xf32>
    %14 = arith.addf %11, %13 : vector<8x128xf32>
    %cst_11 = arith.constant 0.000000e+00 : f32
    %15 = vector.broadcast %cst_11 : f32 to vector<8x128xf32>
    %16 = arith.maximumf %14, %15 : vector<8x128xf32>
    %17 = arith.truncf %16 : vector<8x128xf32> to vector<8x128xbf16>
    %c0_12 = arith.constant 0 : index
    %c0_13 = arith.constant 0 : index
    %18 = vector.load %arg6[%c0_12, %c0_13] : memref<128x128xbf16, #tpu.memory_space<vmem>>, vector<128x128xbf16>
    %cst_14 = arith.constant dense<0.000000e+00> : vector<8x128xf32>
    %19 = tpu.matmul %17, %18, %cst_14 {dimension_numbers = #tpu.dot_dimension_numbers<[1], [0], [0], [1], [0, 0, 1, 1], [], []>} : vector<8x128xbf16>, vector<128x128xbf16>, vector<8x128xf32> -> vector<8x128xf32>
    %c0_15 = arith.constant 0 : index
    %c0_16 = arith.constant 0 : index
    %20 = vector.load %arg7[%c0_15, %c0_16] : memref<1x128xf32, #tpu.memory_space<vmem>>, vector<1x128xf32>
    %21 = vector.broadcast %20 : vector<1x128xf32> to vector<8x128xf32>
    %22 = arith.addf %19, %21 : vector<8x128xf32>
    %c0_17 = arith.constant 0 : index
    %c0_18 = arith.constant 0 : index
    %23 = vector.load %arg8[%c0_17, %c0_18] : memref<8x128xf32, #tpu.memory_space<vmem>>, vector<8x128xf32>
    tpu.vector_store %arg8[%c0_17, %c0_18], %22 {strides = array<i32>} : memref<8x128xf32, #tpu.memory_space<vmem>>, vector<8x128xf32>,
    return
  }
  func.func @transform_0(%arg0: i32) -> (i32, i32) {
    %c0_i32 = arith.constant 0 : i32
    %c0_i32_0 = arith.constant 0 : i32
    return %arg0, %c0_i32 : i32, i32
  }
  func.func @transform_1(%arg0: i32) -> (i32, i32) {
    %c0_i32 = arith.constant 0 : i32
    %c0_i32_0 = arith.constant 0 : i32
    %c0_i32_1 = arith.constant 0 : i32
    return %c0_i32, %c0_i32_0 : i32, i32
  }
  func.func @transform_2(%arg0: i32) -> (i32, i32) {
    %c0_i32 = arith.constant 0 : i32
    %c0_i32_0 = arith.constant 0 : i32
    %c0_i32_1 = arith.constant 0 : i32
    return %c0_i32, %c0_i32_0 : i32, i32
  }
  func.func @transform_3(%arg0: i32) -> (i32, i32) {
    %c0_i32 = arith.constant 0 : i32
    %c0_i32_0 = arith.constant 0 : i32
    %c0_i32_1 = arith.constant 0 : i32
    return %c0_i32, %c0_i32_0 : i32, i32
  }
  func.func @transform_4(%arg0: i32) -> (i32, i32) {
    %c0_i32 = arith.constant 0 : i32
    %c0_i32_0 = arith.constant 0 : i32
    %c0_i32_1 = arith.constant 0 : i32
    return %c0_i32, %c0_i32_0 : i32, i32
  }
  func.func @transform_5(%arg0: i32) -> (i32, i32) {
    %c0_i32 = arith.constant 0 : i32
    %c0_i32_0 = arith.constant 0 : i32
    %c0_i32_1 = arith.constant 0 : i32
    return %c0_i32, %c0_i32_0 : i32, i32
  }
  func.func @transform_6(%arg0: i32) -> (i32, i32) {
    %c0_i32 = arith.constant 0 : i32
    %c0_i32_0 = arith.constant 0 : i32
    %c0_i32_1 = arith.constant 0 : i32
    return %c0_i32, %c0_i32_0 : i32, i32
  }
  func.func @transform_7(%arg0: i32) -> (i32, i32) {
    %c0_i32 = arith.constant 0 : i32
    %c0_i32_0 = arith.constant 0 : i32
    return %arg0, %c0_i32 : i32, i32
  }
}

</mosaic_0001>

<bundles_post_ra>
// kernel: lenet_300_100_forward.1
= control target key start
LH: loop header
LB: loop body
LE: loop exit
PB: predicated region body
PF: predicated region fallthrough
CT: control target
= control target key end

     0   :  { %12 = vsyncpa [#allocation3], 0  ;;  %s2393_s24 = smov [#allocation2]   ;;  %s2617_s0 = inlined_call_operand.vmem [shape: f32[8,784], index: 0, kind: input, shape index: {}]   ;;  %s2618_s1 = inlined_call_operand.hbm [shape: bf16[784,384], index: 1, kind: input, shape index: {}]   ;;  %s2619_s2 = inlined_call_operand.vmem [shape: f32[1,384], index: 2, kind: input, shape index: {}]   ;;  %s2620_s3 = inlined_call_operand.vmem [shape: bf16[384,128], index: 3, kind: input, shape index: {}]   ;;  %s2621_s4 = inlined_call_operand.vmem [shape: f32[1,128], index: 4, kind: input, shape index: {}]   ;;  %s2622_s5 = inlined_call_operand.vmem [shape: bf16[128,128], index: 5, kind: input, shape index: {}]   ;;  %s2623_s6 = inlined_call_operand.vmem [shape: f32[1,128], index: 6, kind: input, shape index: {}]   ;;  %s2624_s7 = inlined_call_operand.vmem [shape: f32[8,128], index: 7, kind: output, shape index: {}]  }
   0x1   :  { %s20_s25 = sshll.u32 %s2393_s24, 4  ;;  %s2369_s28 = scalar_lea.hbm %s2618_s1, 18816  ;;  %s21_s25 = int_to_ptr.vmem [resolvable:$true] %s20_s25 }
   0x2   :  { %p2370_p0 = scmp.ne.s32.totalorder %s2618_s1, %s2369_s28  ;;  %p2373_p1 = scmp.lt.u32.totalorder %s2369_s28, %s2618_s1 }
   0x4   :  { %p2375_p2 = pnand %p2373_p1, %p2370_p0 }
   0x6   :  { %2378 = shalt.err (!%p2375_p2)
}
   0x7   :  { %s2379_s10 = scalar_lea.vmem %s21_s25, 18816  ;;  %p2384_p4 = scmp.lt.s32.totalorder %s21_s25, %s21_s25 }
   0x8   :  { %p2380_p3 = scmp.ne.s32.totalorder %s21_s25, %s2379_s10  ;;  %p2385_p5 = scmp.lt.s32.totalorder %s2379_s10, %s2379_s10 }
   0xa   :  { %p2386_p6 = por %p2385_p5, %p2384_p4 }
   0xc   :  { %p2387_p7 = pnand %p2386_p6, %p2380_p3 }
   0xe   :  { %2390 = shalt.err (!%p2387_p7)
}
   0xf   :  { %s2394_s11 = smov 192   ;;  %s2395_s12 = smov 12  }
  0x10   :  { %26 = dma.hbm_to_vmem [thread:$0]  %s2618_s1, 18816, %s21_s25, [#allocation3], %s2394_s11, %s2394_s11, %s2395_s12  }
  0x11   :  { %2391 = dma.done.wait [#allocation3], 18816  }
  0x12   :  { %2392 = vsyncadd [#allocation3], 4294948480  ;;  %v2141_v0 = vld [vmem:[#allocation2 + $0x4] ss:$12 sps:$4 sm:$0xff]   ;;  %v2143_v1 = vld [vmem:[#allocation2] ss:$12 sps:$4 sm:$0xff]  }
  0x13   :  { %1056 = vmatprep.subr.bf16.mxu0 %v2141_v0  ;;  %v2144_v2 = vld [vmem:[#allocation2 + $0x1c] ss:$12 sps:$4 sm:$0xff]   ;;  %v2146_v3 = vld [vmem:[#allocation2 + $0x18] ss:$12 sps:$4 sm:$0xff]   ;;  %v2147_v4 = vld [vmem:[#allocation2 + $0x34] ss:$12 sps:$4 sm:$0xff]  }
  0x14   :  { %1057 = vmatpush1.bf16.msra.mxu0 %v2143_v1  ;;  %v2149_v5 = vld [vmem:[#allocation2 + $0x30] ss:$12 sps:$4 sm:$0xff]   ;;  %v2150_v6 = vld [vmem:[#allocation2 + $0x4c] ss:$12 sps:$4 sm:$0xff]   ;;  %v2152_v7 = vld [vmem:[#allocation2 + $0x48] ss:$12 sps:$4 sm:$0xff]  }
  0x15   :  { %1058 = vmatprep.subr.bf16.mxu0 %v2144_v2  ;;  %v2153_v8 = vld [vmem:[#allocation2 + $0x64] ss:$12 sps:$4 sm:$0xff]   ;;  %v2155_v9 = vld [vmem:[#allocation2 + $0x60] ss:$12 sps:$4 sm:$0xff]   ;;  %v2156_v10 = vld [vmem:[#allocation2 + $0x7c] ss:$12 sps:$4 sm:$0xff]  }
  0x16   :  { %v2158_v11 = vld [vmem:[#allocation2 + $0x78] ss:$12 sps:$4 sm:$0xff]   ;;  %v2159_v12 = vld [vmem:[#allocation2 + $0x94] ss:$12 sps:$4 sm:$0xff]   ;;  %v42_v13 = vld [vmem:[%s2617_s0 + $0x8] sm:$0xff]  ;;  %vm1052_vm0 = vcmask 130048  }
  0x17   :  { %v49_v14 = vpack.c.bf16 %v42_v13, %v42_v13  ;;  %v2161_v15 = vld [vmem:[#allocation2 + $0x90] ss:$12 sps:$4 sm:$0xff]   ;;  %v2162_v16 = vld [vmem:[#allocation2 + $0xac] ss:$12 sps:$4 sm:$0xff]   ;;  %v2195_v17 = vld [vmem:[#allocation2 + $0xc8] ss:$12 sps:$4 sm:$0xff]  }
  0x18   :  { %1059 = vmatpush1.bf16.msra.mxu0 %v2146_v3  ;;  %v2196_v18 = vld [vmem:[#allocation2 + $0x8] ss:$12 sps:$4 sm:$0xff]   ;;  %v2165_v20 = vld [vmem:[#allocation2 + $0xc4] ss:$12 sps:$4 sm:$0xff]   ;;  %1967 = vmatprep.subr.bf16.mxu1 %v2195_v17  ;;  %v2200_v21 = vld [vmem:[#allocation2 + $0xe0] ss:$12 sps:$4 sm:$0xff]  }
  0x19   :  { %1060 = vmatprep.subr.bf16.mxu0 %v2147_v4  ;;  %1088 = vmatprep.mubr.bf16.mxu0 %v49_v14  ;;  %v2164_v19 = vld [vmem:[#allocation2 + $0xa8] ss:$12 sps:$4 sm:$0xff]   ;;  %v2201_v22 = vld [vmem:[#allocation2 + $0x20] ss:$12 sps:$4 sm:$0xff]   ;;  %v2205_v25 = vld [vmem:[#allocation2 + $0xf8] ss:$12 sps:$4 sm:$0xff]  }
  0x1a   :  { %1252 = vmatprep.mubr.bf16.mxu1 %v49_v14  ;;  %1968 = vmatpush3.bf16.msra.mxu1 %v2196_v18  ;;  %v2167_v23 = vld [vmem:[#allocation2 + $0xc0] ss:$12 sps:$4 sm:$0xff]   ;;  %v2168_v24 = vld [vmem:[#allocation2 + $0xdc] ss:$12 sps:$4 sm:$0xff]   ;;  %v2206_v26 = vld [vmem:[#allocation2 + $0x38] ss:$12 sps:$4 sm:$0xff]  }
  0x1b   :  { %1969 = vmatprep.subr.bf16.mxu1 %v2200_v21  ;;  %v2170_v27 = vld [vmem:[#allocation2 + $0xd8] ss:$12 sps:$4 sm:$0xff]   ;;  %v2171_v28 = vld [vmem:[#allocation2 + $0xf4] ss:$12 sps:$4 sm:$0xff]   ;;  %v2210_v29 = vld [vmem:[#allocation2 + $0x110] ss:$12 sps:$4 sm:$0xff]  }
  0x1c   :  { %1061 = vmatpush1.bf16.msra.mxu0 %v2149_v5  ;;  %v2211_v30 = vld [vmem:[#allocation2 + $0x50] ss:$12 sps:$4 sm:$0xff]   ;;  %v2215_v32 = vld [vmem:[#allocation2 + $0x128] ss:$12 sps:$4 sm:$0xff]   ;;  %v2174_v33 = vld [vmem:[#allocation2 + $0x10c] ss:$12 sps:$4 sm:$0xff]  }
  0x1d   :  { %1062 = vmatprep.subr.bf16.mxu0 %v2150_v6  ;;  %v2173_v31 = vld [vmem:[#allocation2 + $0xf0] ss:$12 sps:$4 sm:$0xff]   ;;  %v2216_v34 = vld [vmem:[#allocation2 + $0x68] ss:$12 sps:$4 sm:$0xff]   ;;  %v2220_v35 = vld [vmem:[#allocation2 + $0x140] ss:$12 sps:$4 sm:$0xff]  }
  0x1e   :  { %1970 = vmatpush3.bf16.msra.mxu1 %v2201_v22  ;;  %v2176_v36 = vld [vmem:[#allocation2 + $0x108] ss:$12 sps:$4 sm:$0xff]   ;;  %v2177_v37 = vld [vmem:[#allocation2 + $0x124] ss:$12 sps:$4 sm:$0xff]   ;;  %v2221_v38 = vld [vmem:[#allocation2 + $0x80] ss:$12 sps:$4 sm:$0xff]  }
  0x1f   :  { %1971 = vmatprep.subr.bf16.mxu1 %v2205_v25  ;;  %v2225_v39 = vld [vmem:[#allocation2 + $0x158] ss:$12 sps:$4 sm:$0xff]   ;;  %v2179_v40 = vld [vmem:[#allocation2 + $0x120] ss:$12 sps:$4 sm:$0xff]   ;;  %v2180_v41 = vld [vmem:[#allocation2 + $0x13c] ss:$12 sps:$4 sm:$0xff]  }
  0x20   :  { %1063 = vmatpush1.bf16.msra.mxu0 %v2152_v7  ;;  %v2226_v42 = vld [vmem:[#allocation2 + $0x98] ss:$12 sps:$4 sm:$0xff]   ;;  %v2230_v43 = vld [vmem:[#allocation2 + $0x170] ss:$12 sps:$4 sm:$0xff]   ;;  %v2183_v45 = vld [vmem:[#allocation2 + $0x154] ss:$12 sps:$4 sm:$0xff]  }
  0x21   :  { %1064 = vmatprep.subr.bf16.mxu0 %v2153_v8  ;;  %v2182_v44 = vld [vmem:[#allocation2 + $0x138] ss:$12 sps:$4 sm:$0xff]   ;;  %v2231_v46 = vld [vmem:[#allocation2 + $0xb0] ss:$12 sps:$4 sm:$0xff]   ;;  %v2235_v47 = vld [vmem:[#allocation2 + $0x248] ss:$12 sps:$4 sm:$0xff]  }
  0x22   :  { %1972 = vmatpush3.bf16.msra.mxu1 %v2206_v26  ;;  %v2185_v48 = vld [vmem:[#allocation2 + $0x150] ss:$12 sps:$4 sm:$0xff]   ;;  %v41_v49 = vld [vmem:[%s2617_s0] sm:$0xff]  ;;  %v2186_v50 = vld [vmem:[#allocation2 + $0x16c] ss:$12 sps:$4 sm:$0xff]   ;;  %vm2397_vm1 = vmmov 0  }
  0x23   :  { %1973 = vmatprep.subr.bf16.mxu1 %v2210_v29  ;;  %v2236_v51 = vld [vmem:[#allocation2 + $0x188] ss:$12 sps:$4 sm:$0xff]   ;;  %v48_v52 = vpack.c.bf16 %v41_v49, %v41_v49  ;;  %v2240_v53 = vld [vmem:[#allocation2 + $0x260] ss:$12 sps:$4 sm:$0xff]   ;;  %v2191_v55 = vld [vmem:[#allocation2 + $0x184] ss:$12 sps:$4 sm:$0xff]  }
  0x24   :  { %1065 = vmatpush1.bf16.msra.mxu0 %v2155_v9  ;;  %v2188_v54 = vld [vmem:[#allocation2 + $0x168] ss:$12 sps:$4 sm:$0xff]   ;;  %v2241_v56 = vld [vmem:[#allocation2 + $0x1a0] ss:$12 sps:$4 sm:$0xff]   ;;  %v2245_v57 = vld [vmem:[#allocation2 + $0x278] ss:$12 sps:$4 sm:$0xff]  }
  0x25   :  { %1066 = vmatprep.subr.bf16.mxu0 %v2156_v10  ;;  %v2189_v58 = vld [vmem:[#allocation2 + $0x180] ss:$12 sps:$4 sm:$0xff]   ;;  %v2194_v59 = vld [vmem:[#allocation2 + $0x19c] ss:$12 sps:$4 sm:$0xff]   ;;  %v2246_v60 = vld [vmem:[#allocation2 + $0x1b8] ss:$12 sps:$4 sm:$0xff]  }
  0x26   :  { %1974 = vmatpush3.bf16.msra.mxu1 %v2211_v30  ;;  %v2250_v61 = vld [vmem:[#allocation2 + $0x290] ss:$12 sps:$4 sm:$0xff]   ;;  %v2192_v62 = vld [vmem:[#allocation2 + $0x198] ss:$12 sps:$4 sm:$0xff]   ;;  %v2199_v63 = vld [vmem:[#allocation2 + $0x1b4] ss:$12 sps:$4 sm:$0xff]  }
  0x27   :  { %1975 = vmatprep.subr.bf16.mxu1 %v2215_v32  ;;  %v2251_v0 = vld [vmem:[#allocation2 + $0x1d0] ss:$12 sps:$4 sm:$0xff]   ;;  %v2255_v1 = vld [vmem:[#allocation2 + $0x2a8] ss:$12 sps:$4 sm:$0xff]   ;;  %v2204_v3 = vld [vmem:[#allocation2 + $0x1cc] ss:$12 sps:$4 sm:$0xff]  }
  0x28   :  { %1067 = vmatpush1.bf16.msra.mxu0 %v2158_v11  ;;  %v2197_v2 = vld [vmem:[#allocation2 + $0x1b0] ss:$12 sps:$4 sm:$0xff]   ;;  %v2256_v4 = vld [vmem:[#allocation2 + $0x1e8] ss:$12 sps:$4 sm:$0xff]   ;;  %v2260_v5 = vld [vmem:[#allocation2 + $0x2c0] ss:$12 sps:$4 sm:$0xff]  }
  0x29   :  { %1068 = vmatprep.subr.bf16.mxu0 %v2159_v12  ;;  %v44_v6 = vld [vmem:[%s2617_s0 + $0x18] sm:$0xff]  ;;  %v2202_v7 = vld [vmem:[#allocation2 + $0x1c8] ss:$12 sps:$4 sm:$0xff]   ;;  %v2209_v9 = vld [vmem:[#allocation2 + $0x1e4] ss:$12 sps:$4 sm:$0xff]  }
  0x2a   :  { %1976 = vmatpush3.bf16.msra.mxu1 %v2216_v34  ;;  %v51_v8 = vpack.c.bf16 %v44_v6, %v44_v6  ;;  %v2261_v10 = vld [vmem:[#allocation2 + $0x200] ss:$12 sps:$4 sm:$0xff]   ;;  %v2265_v11 = vld [vmem:[#allocation2 + $0x2d8] ss:$12 sps:$4 sm:$0xff]   ;;  %v2214_v13 = vld [vmem:[#allocation2 + $0x1fc] ss:$12 sps:$4 sm:$0xff]  }
  0x2b   :  { %1977 = vmatprep.subr.bf16.mxu1 %v2220_v35  ;;  %v2207_v12 = vld [vmem:[#allocation2 + $0x1e0] ss:$12 sps:$4 sm:$0xff]   ;;  %v2266_v14 = vld [vmem:[#allocation2 + $0x218] ss:$12 sps:$4 sm:$0xff]   ;;  %v2271_v18 = vld [vmem:[#allocation2 + $0x230] ss:$12 sps:$4 sm:$0xff]  }
  0x2c   :  { %1069 = vmatpush1.bf16.msra.mxu0 %v2161_v15  ;;  %v2270_v15 = vld [vmem:[#allocation2 + $0x2f0] ss:$12 sps:$4 sm:$0xff]   ;;  %v2219_v17 = vld [vmem:[#allocation2 + $0x214] ss:$12 sps:$4 sm:$0xff]   ;;  %v2224_v22 = vld [vmem:[#allocation2 + $0x22c] ss:$12 sps:$4 sm:$0xff]  }
  0x2d   :  { %1070 = vmatprep.subr.bf16.mxu0 %v2162_v16  ;;  %v2212_v16 = vld [vmem:[#allocation2 + $0x1f8] ss:$12 sps:$4 sm:$0xff]   ;;  %v2217_v21 = vld [vmem:[#allocation2 + $0x210] ss:$12 sps:$4 sm:$0xff]   ;;  %v2280_v25 = vld [vmem:[#allocation2 + $0x3e0] ss:$12 sps:$4 sm:$0xff]  }
  0x2e   :  { %1978 = vmatpush3.bf16.msra.mxu1 %v2221_v38  ;;  %v2222_v26 = vld [vmem:[#allocation2 + $0x228] ss:$12 sps:$4 sm:$0xff]   ;;  %v2285_v29 = vld [vmem:[#allocation2 + $0x3f8] ss:$12 sps:$4 sm:$0xff]   ;;  %v2227_v30 = vld [vmem:[#allocation2 + $0x240] ss:$12 sps:$4 sm:$0xff]  }
  0x2f   :  { %1979 = vmatprep.subr.bf16.mxu1 %v2225_v39  ;;  %v2286_v32 = vld [vmem:[#allocation2 + $0x338] ss:$12 sps:$4 sm:$0xff]   ;;  %v2239_v35 = vld [vmem:[#allocation2 + $0x274] ss:$12 sps:$4 sm:$0xff]   ;;  %v2237_v38 = vld [vmem:[#allocation2 + $0x270] ss:$12 sps:$4 sm:$0xff]  }
  0x30   :  { %1071 = vmatpush1.bf16.msra.mxu0 %v2164_v19  ;;  %v2275_v19 = vld [vmem:[#allocation2 + $0x3c8] ss:$12 sps:$4 sm:$0xff]   ;;  %v2232_v34 = vld [vmem:[#allocation2 + $0x258] ss:$12 sps:$4 sm:$0xff]  }
  0x31   :  { %1072 = vmatprep.subr.bf16.mxu0 %v2165_v20  ;;  %v43_v20 = vld [vmem:[%s2617_s0 + $0x10] sm:$0xff]  ;;  %v2244_v39 = vld [vmem:[#allocation2 + $0x28c] ss:$12 sps:$4 sm:$0xff]   ;;  %v2254_v49 = vld [vmem:[#allocation2 + $0x2bc] ss:$12 sps:$4 sm:$0xff]  }
  0x32   :  { %1980 = vmatpush3.bf16.msra.mxu1 %v2226_v42  ;;  %v46_v42 = vld [vmem:[%s2617_s0 + $0x28] sm:$0xff] }
  0x33   :  { %1981 = vmatprep.subr.bf16.mxu1 %v2230_v43  ;;  %v2242_v43 = vld [vmem:[#allocation2 + $0x288] ss:$12 sps:$4 sm:$0xff]   ;;  %v2284_v6 = vld [vmem:[#allocation2 + $0x34c] ss:$12 sps:$4 sm:$0xff]  }
  0x34   :  { %1073 = vmatpush1.bf16.msra.mxu0 %v2167_v23  ;;  %v2276_v23 = vld [vmem:[#allocation2 + $0x308] ss:$12 sps:$4 sm:$0xff]  }
  0x35   :  { %1074 = vmatprep.subr.bf16.mxu0 %v2168_v24  ;;  %v2463_v24 = vpack.c.bf16 %v43_v20, %v43_v20  ;;  %v2317_v20 = vld [vmem:[#allocation2 + $0x3f4] ss:$12 sps:$4 sm:$0xff]  }
  0x36   :  { %1982 = vmatpush3.bf16.msra.mxu1 %v2231_v46  ;;  %v2301_v46 = vld [vmem:[#allocation2 + $0x380] ss:$12 sps:$4 sm:$0xff]  }
  0x37   :  { %1989 = vmatprep.subr.bf16.mxu1 %v2235_v47  ;;  %v2305_v47 = vld [vmem:[#allocation2 + $0x458] ss:$12 sps:$4 sm:$0xff]  }
  0x38   :  { %1075 = vmatpush1.bf16.msra.mxu0 %v2170_v27  ;;  %v2229_v27 = vld [vmem:[#allocation2 + $0x244] ss:$12 sps:$4 sm:$0xff]  }
  0x39   :  { %1076 = vmatprep.subr.bf16.mxu0 %v2171_v28  ;;  %1253 = vmatmul.mubr.bf16.vlgmr.msra.gmra.mrb[0].mxu1 %v48_v52  ;;  %v2281_v28 = vld [vmem:[#allocation2 + $0x320] ss:$12 sps:$4 sm:$0xff]  }
  0x3a   :  { %1990 = vmatpush3.bf16.msra.mxu1 %v2236_v51  ;;  %1292 = vmatprep.mubr.bf16.mxu1 %v51_v8  ;;  %v2310_v51 = vld [vmem:[#allocation2 + $0x470] ss:$12 sps:$4 sm:$0xff]  }
  0x3b   :  { %1991 = vmatprep.subr.bf16.mxu1 %v2240_v53  ;;  %v2259_v53 = vld [vmem:[#allocation2 + $0x2d4] ss:$12 sps:$4 sm:$0xff]  }
  0x3c   :  { %1077 = vmatpush1.bf16.msra.mxu0 %v2173_v31  ;;  %v2234_v31 = vld [vmem:[#allocation2 + $0x25c] ss:$12 sps:$4 sm:$0xff]  }
  0x3d   :  { %1078 = vmatprep.subr.bf16.mxu0 %v2174_v33  ;;  %v2290_v33 = vld [vmem:[#allocation2 + $0x410] ss:$12 sps:$4 sm:$0xff]  }
  0x3e   :  { %1992 = vmatpush3.bf16.msra.mxu1 %v2241_v56  ;;  %v2257_v56 = vld [vmem:[#allocation2 + $0x2d0] ss:$12 sps:$4 sm:$0xff]  }
  0x3f   :  { %1993 = vmatprep.subr.bf16.mxu1 %v2245_v57  ;;  %v2264_v57 = vld [vmem:[#allocation2 + $0x2ec] ss:$12 sps:$4 sm:$0xff]  }
  0x40   :  { %1079 = vmatpush1.bf16.msra.mxu0 %v2176_v36  ;;  %v2291_v36 = vld [vmem:[#allocation2 + $0x350] ss:$12 sps:$4 sm:$0xff]  }
  0x41   :  { %1080 = vmatprep.subr.bf16.mxu0 %v2177_v37  ;;  %v2295_v37 = vld [vmem:[#allocation2 + $0x428] ss:$12 sps:$4 sm:$0xff]  }
  0x42   :  { %1994 = vmatpush3.bf16.msra.mxu1 %v2246_v60  ;;  %v2262_v60 = vld [vmem:[#allocation2 + $0x2e8] ss:$12 sps:$4 sm:$0xff]  }
  0x43   :  { %1995 = vmatprep.subr.bf16.mxu1 %v2250_v61  ;;  %v2396_v61 = vmov 0.0  }
  0x44   :  { %1081 = vmatpush1.bf16.msra.mxu0 %v2179_v40  ;;  %v2296_v40 = vld [vmem:[#allocation2 + $0x368] ss:$12 sps:$4 sm:$0xff]  }
  0x45   :  { %1082 = vmatprep.subr.bf16.mxu0 %v2180_v41  ;;  %v2300_v41 = vld [vmem:[#allocation2 + $0x440] ss:$12 sps:$4 sm:$0xff]  }
  0x46   :  { %1996 = vmatpush3.bf16.msra.mxu1 %v2251_v0  ;;  %v2267_v0 = vld [vmem:[#allocation2 + $0x300] ss:$12 sps:$4 sm:$0xff]  }
  0x47   :  { %1997 = vmatprep.subr.bf16.mxu1 %v2255_v1  ;;  %v2274_v1 = vld [vmem:[#allocation2 + $0x31c] ss:$12 sps:$4 sm:$0xff]  }
  0x48   :  { %1083 = vmatpush1.bf16.msra.mxu0 %v2182_v44  ;;  %v53_v44 = vpack.c.bf16 %v46_v42, %v46_v42  ;;  %v2344_v42 = vld [vmem:[%s2620_s3 + $0x18] sm:$0xff]  }
  0x49   :  { %1084 = vmatprep.subr.bf16.mxu0 %v2183_v45  ;;  %v2249_v45 = vld [vmem:[#allocation2 + $0x2a4] ss:$12 sps:$4 sm:$0xff]  }
  0x4a   :  { %1998 = vmatpush3.bf16.msra.mxu1 %v2256_v4  ;;  %v2279_v4 = vld [vmem:[#allocation2 + $0x334] ss:$12 sps:$4 sm:$0xff]  }
  0x4b   :  { %1999 = vmatprep.subr.bf16.mxu1 %v2260_v5  ;;  %v2277_v5 = vld [vmem:[#allocation2 + $0x330] ss:$12 sps:$4 sm:$0xff]  }
  0x4c   :  { %1085 = vmatpush1.bf16.msra.mxu0 %v2185_v48  ;;  %v2247_v48 = vld [vmem:[#allocation2 + $0x2a0] ss:$12 sps:$4 sm:$0xff]  }
  0x4d   :  { %1086 = vmatprep.subr.bf16.mxu0 %v2186_v50  ;;  %v2306_v50 = vld [vmem:[#allocation2 + $0x398] ss:$12 sps:$4 sm:$0xff]  }
  0x4e   :  { %2000 = vmatpush3.bf16.msra.mxu1 %v2261_v10  ;;  %v2294_v10 = vld [vmem:[#allocation2 + $0x37c] ss:$12 sps:$4 sm:$0xff]  }
  0x4f   :  { %2001 = vmatprep.subr.bf16.mxu1 %v2265_v11  ;;  %v2292_v11 = vld [vmem:[#allocation2 + $0x378] ss:$12 sps:$4 sm:$0xff]  }
  0x50   :  { %1087 = vmatpush1.bf16.msra.mxu0 %v2188_v54  ;;  %v2311_v54 = vld [vmem:[#allocation2 + $0x3b0] ss:$12 sps:$4 sm:$0xff]  }
  0x51   :  { %1097 = vmatprep.subr.bf16.mxu0 %v2191_v55  ;;  %v45_v55 = vld [vmem:[%s2617_s0 + $0x20] sm:$0xff] }
  0x52   :  { %2002 = vmatpush3.bf16.msra.mxu1 %v2266_v14  ;;  %v2304_v14 = vld [vmem:[#allocation2 + $0x3ac] ss:$12 sps:$4 sm:$0xff]  }
  0x53   :  { %1089 = vmatmul.mubr.bf16.vlgmr.msra.gmra.mrb[0].mxu0 %v48_v52  ;;  %2003 = vmatprep.subr.bf16.mxu1 %v2270_v15  ;;  %v2252_v52 = vld [vmem:[#allocation2 + $0x2b8] ss:$12 sps:$4 sm:$0xff]   ;;  %v2302_v15 = vld [vmem:[#allocation2 + $0x3a8] ss:$12 sps:$4 sm:$0xff]  }
  0x54   :  { %1098 = vmatpush1.bf16.msra.mxu0 %v2189_v58  ;;  %1129 = vmatprep.mubr.bf16.mxu0 %v51_v8  ;;  %v2318_v58 = vld [vmem:[#allocation2 + $0x488] ss:$12 sps:$4 sm:$0xff]   ;;  %v2289_v8 = vld [vmem:[#allocation2 + $0x364] ss:$12 sps:$4 sm:$0xff]  }
  0x55   :  { %1099 = vmatprep.subr.bf16.mxu0 %v2194_v59  ;;  %v2472_v59 = vpack.c.bf16 %v45_v55, %v45_v55 }
  0x56   :  { %2004 = vmatpush3.bf16.msra.mxu1 %v2271_v18  ;;  %v2314_v18 = vld [vmem:[#allocation2 + $0x3dc] ss:$12 sps:$4 sm:$0xff]  }
  0x57   :  { %2011 = vmatprep.subr.bf16.mxu1 %v2275_v19  ;;  %v2312_v19 = vld [vmem:[#allocation2 + $0x3d8] ss:$12 sps:$4 sm:$0xff]  }
  0x58   :  { %1100 = vmatpush1.bf16.msra.mxu0 %v2192_v62  ;;  %v2269_v62 = vld [vmem:[#allocation2 + $0x304] ss:$12 sps:$4 sm:$0xff]  }
  0x59   :  { %1101 = vmatprep.subr.bf16.mxu0 %v2199_v63  ;;  %1293 = vmatmul.mubr.bf16.vlgmr.msra.gmra.mrb[4].mxu1 %v2463_v24  ;;  %v47_v63 = vld [vmem:[%s2617_s0 + $0x30] sm:$0xff] }
  0x5a   :  { %2012 = vmatpush3.bf16.msra.mxu1 %v2276_v23  ;;  %1332 = vmatprep.mubr.bf16.mxu1 %v53_v44  ;;  %v2319_v23 = vld [vmem:[#allocation2 + $0x408] ss:$12 sps:$4 sm:$0xff]  }
  0x5b   :  { %2013 = vmatprep.subr.bf16.mxu1 %v2280_v25  ;;  %v2322_v25 = vld [vmem:[#allocation2 + $0x420] ss:$12 sps:$4 sm:$0xff]  }
  0x5c   :  { %1102 = vmatpush1.bf16.msra.mxu0 %v2197_v2  ;;  %v2481_v2 = vpack.c.bf16 %v47_v63, %v47_v63 }
  0x5d   :  { %1103 = vmatprep.subr.bf16.mxu0 %v2204_v3  ;;  %v2272_v3 = vld [vmem:[#allocation2 + $0x318] ss:$12 sps:$4 sm:$0xff]  }
  0x5e   :  { %2014 = vmatpush3.bf16.msra.mxu1 %v2281_v28  ;;  %v2330_v28 = vld [vmem:[#allocation2 + $0x454] ss:$12 sps:$4 sm:$0xff]  }
  0x5f   :  { %2015 = vmatprep.subr.bf16.mxu1 %v2285_v29  ;;  %v2328_v29 = vld [vmem:[#allocation2 + $0x450] ss:$12 sps:$4 sm:$0xff]  }
  0x60   :  { %1104 = vmatpush1.bf16.msra.mxu0 %v2202_v7  ;;  %v2282_v7 = vld [vmem:[#allocation2 + $0x348] ss:$12 sps:$4 sm:$0xff]  }
  0x61   :  { %1105 = vmatprep.subr.bf16.mxu0 %v2209_v9  ;;  %v2287_v9 = vld [vmem:[#allocation2 + $0x360] ss:$12 sps:$4 sm:$0xff]  }
  0x62   :  { %2016 = vmatpush3.bf16.msra.mxu1 %v2286_v32  ;;  %v2336_v32 = vld [vmem:[#allocation2 + $0x484] ss:$12 sps:$4 sm:$0xff]  }
  0x63   :  { %2017 = vmatprep.subr.bf16.mxu1 %v2290_v33  ;;  %v2334_v33 = vld [vmem:[#allocation2 + $0x480] ss:$12 sps:$4 sm:$0xff]  }
  0x64   :  { %1106 = vmatpush1.bf16.msra.mxu0 %v2207_v12  ;;  %v2299_v12 = vld [vmem:[#allocation2 + $0x394] ss:$12 sps:$4 sm:$0xff]  }
  0x65   :  { %1107 = vmatprep.subr.bf16.mxu0 %v2214_v13  ;;  %v2297_v13 = vld [vmem:[#allocation2 + $0x390] ss:$12 sps:$4 sm:$0xff]  }
  0x66   :  { %2018 = vmatpush3.bf16.msra.mxu1 %v2291_v36  ;;  %v2338_v36 = vld [vmem:[%s2620_s3] sm:$0xff]  }
  0x67   :  { %2019 = vmatprep.subr.bf16.mxu1 %v2295_v37  ;;  %v2339_v37 = vld [vmem:[%s2620_s3 + $0x48] sm:$0xff]  }
  0x68   :  { %1108 = vmatpush1.bf16.msra.mxu0 %v2212_v16  ;;  %v2309_v16 = vld [vmem:[#allocation2 + $0x3c4] ss:$12 sps:$4 sm:$0xff]  }
  0x69   :  { %1109 = vmatprep.subr.bf16.mxu0 %v2219_v17  ;;  %v2307_v17 = vld [vmem:[#allocation2 + $0x3c0] ss:$12 sps:$4 sm:$0xff]  }
  0x6a   :  { %2020 = vmatpush3.bf16.msra.mxu1 %v2296_v40  ;;  %v2342_v40 = vld [vmem:[%s2620_s3 + $0x10] sm:$0xff]  }
  0x6b   :  { %2021 = vmatprep.subr.bf16.mxu1 %v2300_v41  ;;  %v2343_v41 = vld [vmem:[%s2620_s3 + $0x58] sm:$0xff]  }
  0x6c   :  { %1110 = vmatpush1.bf16.msra.mxu0 %v2217_v21  ;;  %v2315_v21 = vld [vmem:[#allocation2 + $0x3f0] ss:$12 sps:$4 sm:$0xff]  }
  0x6d   :  { %1111 = vmatprep.subr.bf16.mxu0 %v2224_v22  ;;  %v2321_v22 = vld [vmem:[#allocation2 + $0x40c] ss:$12 sps:$4 sm:$0xff]  }
  0x6e   :  { %2022 = vmatpush3.bf16.msra.mxu1 %v2301_v46  ;;  %v2348_v46 = vld [vmem:[%s2620_s3 + $0x28] sm:$0xff]  }
  0x6f   :  { %2023 = vmatprep.subr.bf16.mxu1 %v2305_v47 }
  0x70   :  { %1112 = vmatpush1.bf16.msra.mxu0 %v2222_v26  ;;  %v2327_v26 = vld [vmem:[#allocation2 + $0x43c] ss:$12 sps:$4 sm:$0xff]  }
  0x71   :  { %1113 = vmatprep.subr.bf16.mxu0 %v2229_v27  ;;  %v2325_v27 = vld [vmem:[#allocation2 + $0x438] ss:$12 sps:$4 sm:$0xff]  }
  0x72   :  { %2024 = vmatpush3.bf16.msra.mxu1 %v2306_v50 }
  0x73   :  { %2025 = vmatprep.subr.bf16.mxu1 %v2310_v51 }
  0x74   :  { %1114 = vmatpush1.bf16.msra.mxu0 %v2227_v30  ;;  %v2333_v30 = vld [vmem:[#allocation2 + $0x46c] ss:$12 sps:$4 sm:$0xff]  }
  0x75   :  { %1115 = vmatprep.subr.bf16.mxu0 %v2234_v31  ;;  %v2331_v31 = vld [vmem:[#allocation2 + $0x468] ss:$12 sps:$4 sm:$0xff]  }
  0x76   :  { %2026 = vmatpush3.bf16.msra.mxu1 %v2311_v54  ;;  %v2350_v54 = vld [vmem:[%s2620_s3 + $0x30] sm:$0xff]  }
  0x77   :  { %2075 = vmatprep.subr.bf16.mxu1 %v2396_v61 }
  0x78   :  { %1116 = vmatpush1.bf16.msra.mxu0 %v2232_v34  ;;  %v2398_v34 = vmov 0  }
  0x79   :  { %1117 = vmatprep.subr.bf16.mxu0 %v2239_v35  ;;  %1333 = vmatmul.mubr.bf16.vlgmr.msra.gmra.mrb[8].mxu1 %v2472_v59  ;;  %v2337_v35 = vld [vmem:[%s2620_s3 + $0x40] sm:$0xff]  }
  0x7a   :  { %2076 = vmatpush3.bf16.msra.mxu1 %v2318_v58  ;;  %2077 = vmatprep.mubr.msk.bf16.mxu1 %vm2397_vm1, %v2396_v61 }
  0x7b   :  { %2035 = vmatprep.subr.bf16.mxu1 %v2337_v35  ;;  %v2358_v35 = vld [vmem:[%s2620_s3 + $0xa8] sm:$0xff]  }
  0x7c   :  { %1118 = vmatpush1.bf16.msra.mxu0 %v2237_v38  ;;  %v2340_v38 = vld [vmem:[%s2620_s3 + $0x8] sm:$0xff]  }
  0x7d   :  { %1119 = vmatprep.subr.bf16.mxu0 %v2244_v39  ;;  %v2341_v39 = vld [vmem:[%s2620_s3 + $0x50] sm:$0xff]  }
  0x80   :  { %1120 = vmatpush1.bf16.msra.mxu0 %v2242_v43  ;;  %v2345_v43 = vld [vmem:[%s2620_s3 + $0x60] sm:$0xff]  }
  0x81   :  { %1121 = vmatprep.subr.bf16.mxu0 %v2249_v45  ;;  %2078 = vmatmul.mubr.msk.bf16.vlgmr.msra.gmra.mrb[12].mxu1 %vm1052_vm0, %v2481_v2  ;;  %v2347_v45 = vld [vmem:[%s2620_s3 + $0x68] sm:$0xff]  }
  0x82   :  { %2036 = vmatpush3.bf16.msra.mxu1 %v2338_v36  ;;  %v2359_v36 = vld [vmem:[%s2620_s3 + $0xb0] sm:$0xff]  }
  0x83   :  { %2037 = vmatprep.subr.bf16.mxu1 %v2339_v37  ;;  %v2360_v37 = vld [vmem:[%s2620_s3 + $0xb8] sm:$0xff]  }
  0x84   :  { %1122 = vmatpush1.bf16.msra.mxu0 %v2247_v48 }
  0x85   :  { %1123 = vmatprep.subr.bf16.mxu0 %v2254_v49 }
  0x86   :  { %2038 = vmatpush3.bf16.msra.mxu1 %v2340_v38 }
  0x87   :  { %2039 = vmatprep.subr.bf16.mxu1 %v2341_v39 }
  0x88   :  { %1124 = vmatpush1.bf16.msra.mxu0 %v2252_v52  ;;  %v253_v52 = vlaneseq }
  0x89   :  { %1125 = vmatprep.subr.bf16.mxu0 %v2259_v53  ;;  %v2349_v53 = vld [vmem:[%s2620_s3 + $0x70] sm:$0xff]  }
  0x8a   :  { %2040 = vmatpush3.bf16.msra.mxu1 %v2342_v40  ;;  %v254_v55 = vshrl.u32 %v253_v52, 7  ;;  %v2361_v40 = vld [vmem:[%s2622_s5] sm:$0xff]  }
  0x8b   :  { %2041 = vmatprep.subr.bf16.mxu1 %v2343_v41  ;;  %v2362_v41 = vld [vmem:[%s2622_s5 + $0x8] sm:$0xff]  }
  0x8c   :  { %1126 = vmatpush1.bf16.msra.mxu0 %v2257_v56  ;;  %v2351_v56 = vld [vmem:[%s2620_s3 + $0x78] sm:$0xff]   ;;  %v263_v58 = vsub.s32 2, %v254_v55 }
  0x8d   :  { %1127 = vmatprep.subr.bf16.mxu0 %v2264_v57  ;;  %v2352_v57 = vld [vmem:[%s2620_s3 + $0x38] sm:$0xff]  }
  0x8e   :  { %2042 = vmatpush3.bf16.msra.mxu1 %v2344_v42  ;;  %v2363_v42 = vld [vmem:[%s2622_s5 + $0x10] sm:$0xff]  }
  0x8f   :  { %2043 = vmatprep.subr.bf16.mxu1 %v2345_v43  ;;  %v2364_v43 = vld [vmem:[%s2622_s5 + $0x18] sm:$0xff]  }
  0x90   :  { %1128 = vmatpush1.bf16.msra.mxu0 %v2262_v60 }
  0x91   :  { %1138 = vmatprep.subr.bf16.mxu0 %v2269_v62 }
  0x93   :  { %1130 = vmatmul.mubr.bf16.vlgmr.msra.gmra.mrb[0].mxu0 %v2463_v24  ;;  %v2324_v24 = vld [vmem:[#allocation2 + $0x424] ss:$12 sps:$4 sm:$0xff]  }
  0x94   :  { %1139 = vmatpush1.bf16.msra.mxu0 %v2267_v0  ;;  %1170 = vmatprep.mubr.bf16.mxu0 %v53_v44  ;;  %v2346_v44 = vld [vmem:[%s2620_s3 + $0x20] sm:$0xff]  }
  0x95   :  { %1140 = vmatprep.subr.bf16.mxu0 %v2274_v1  ;;  %2044 = vmatpush3.bf16.msra.mxu1 %v2346_v44  ;;  %v2365_v44 = vld [vmem:[%s2622_s5 + $0x20] sm:$0xff]  }
  0x96   :  { %2045 = vmatprep.subr.bf16.mxu1 %v2347_v45  ;;  %v2366_v45 = vld [vmem:[%s2622_s5 + $0x28] sm:$0xff]  }
  0x98   :  { %1141 = vmatpush1.bf16.msra.mxu0 %v2272_v3 }
  0x99   :  { %1142 = vmatprep.subr.bf16.mxu0 %v2279_v4  ;;  %2046 = vmatpush3.bf16.msra.mxu1 %v2348_v46  ;;  %v2367_v46 = vld [vmem:[%s2622_s5 + $0x30] sm:$0xff]  }
  0x9a   :  { %2047 = vmatprep.subr.bf16.mxu1 %v2349_v53  ;;  %v1933_v53 = vld [vmem:[%s2621_s4] ss:$0 sm:$0xff] }
  0x9c   :  { %1143 = vmatpush1.bf16.msra.mxu0 %v2277_v5 }
  0x9d   :  { %1144 = vmatprep.subr.bf16.mxu0 %v2284_v6  ;;  %2048 = vmatpush3.bf16.msra.mxu1 %v2350_v54 }
  0x9e   :  { %2049 = vmatprep.subr.bf16.mxu1 %v2351_v56 }
  0xa0   :  { %1145 = vmatpush1.bf16.msra.mxu0 %v2282_v7 }
  0xa1   :  { %1146 = vmatprep.subr.bf16.mxu0 %v2289_v8  ;;  %2050 = vmatpush3.bf16.msra.mxu1 %v2352_v57 }
  0xa2   :  { %2081 = vmatprep.subr.bf16.mxu1 %v2396_v61 }
  0xa4   :  { %1147 = vmatpush1.bf16.msra.mxu0 %v2287_v9 }
  0xa5   :  { %1148 = vmatprep.subr.bf16.mxu0 %v2294_v10 }
  0xa8   :  { %1149 = vmatpush1.bf16.msra.mxu0 %v2292_v11 }
  0xa9   :  { %1150 = vmatprep.subr.bf16.mxu0 %v2299_v12 }
  0xac   :  { %1151 = vmatpush1.bf16.msra.mxu0 %v2297_v13 }
  0xad   :  { %1152 = vmatprep.subr.bf16.mxu0 %v2304_v14 }
  0xb0   :  { %1153 = vmatpush1.bf16.msra.mxu0 %v2302_v15 }
  0xb1   :  { %1154 = vmatprep.subr.bf16.mxu0 %v2309_v16  ;;  %v255_v16 = vsub.s32 0, %v254_v55 }
  0xb4   :  { %1155 = vmatpush1.bf16.msra.mxu0 %v2307_v17  ;;  %v259_v17 = vsub.s32 1, %v254_v55 }
  0xb5   :  { %1156 = vmatprep.subr.bf16.mxu0 %v2314_v18 }
  0xb8   :  { %1157 = vmatpush1.bf16.msra.mxu0 %v2312_v19 }
  0xb9   :  { %1158 = vmatprep.subr.bf16.mxu0 %v2317_v20 }
  0xbc   :  { %1159 = vmatpush1.bf16.msra.mxu0 %v2315_v21 }
  0xbd   :  { %1160 = vmatprep.subr.bf16.mxu0 %v2321_v22 }
  0xc0   :  { %1161 = vmatpush1.bf16.msra.mxu0 %v2319_v23 }
  0xc1   :  { %1162 = vmatprep.subr.bf16.mxu0 %v2324_v24 }
  0xc4   :  { %1163 = vmatpush1.bf16.msra.mxu0 %v2322_v25 }
  0xc5   :  { %1164 = vmatprep.subr.bf16.mxu0 %v2327_v26 }
  0xc8   :  { %1165 = vmatpush1.bf16.msra.mxu0 %v2325_v27 }
  0xc9   :  { %1166 = vmatprep.subr.bf16.mxu0 %v2330_v28 }
  0xcc   :  { %1167 = vmatpush1.bf16.msra.mxu0 %v2328_v29  ;;  %v2353_v29 = vld [vmem:[%s2620_s3 + $0x80] sm:$0xff]  }
  0xcd   :  { %1168 = vmatprep.subr.bf16.mxu0 %v2333_v30 }
  0xd0   :  { %1169 = vmatpush1.bf16.msra.mxu0 %v2331_v31  ;;  %v2354_v31 = vld [vmem:[%s2620_s3 + $0x88] sm:$0xff]  }
  0xd1   :  { %1179 = vmatprep.subr.bf16.mxu0 %v2336_v32  ;;  %v2355_v32 = vld [vmem:[%s2620_s3 + $0x90] sm:$0xff]  }
  0xd3   :  { %1171 = vmatmul.mubr.bf16.vlgmr.msra.gmra.mrb[0].mxu0 %v2472_v59  ;;  %v251_v59 = vld [vmem:[%s2619_s2] sm:$0x7] }
  0xd4   :  { %1180 = vmatpush1.bf16.msra.mxu0 %v2334_v33  ;;  %1211 = vmatprep.mubr.bf16.mxu0 %v2398_v34  ;;  %v264_v60 = vrot.slane %v251_v59, %v263_v58  ;;  %v256_v18 = vrot.slane %v251_v59, %v255_v16  ;;  %v260_v19 = vrot.slane %v251_v59, %v259_v17  ;;  %v2356_v33 = vld [vmem:[%s2620_s3 + $0x98] sm:$0xff]   ;;  %v2357_v34 = vld [vmem:[%s2620_s3 + $0xa0] sm:$0xff]  }
  0xdf   :  { %1931 = vmatmul.mubr.msk.bf16.vlgmr.msra.gmra.mrb[0].mxu0 %vm1052_vm0, %v2481_v2 }
 0x10c   :  { %v1983_v47 = vpop.f32.mrb[0].mxu1 }
 0x10d   :  { %v1984_v48 = vpop.f32.mrb[1].mxu1 }
 0x10e   :  { %v1985_v49 = vadd.f32 %v1984_v48, %v1983_v47  ;;  %v1986_v50 = vpop.f32.mrb[2].mxu1  ;;  %v2368_v47 = vld [vmem:[%s2622_s5 + $0x38] sm:$0xff]  }
 0x10f   :  { %v1987_v51 = vpop.f32.mrb[3].mxu1 }
 0x110   :  { %v1255_v62 = vadd.f32 %v1985_v49, %v264_v60 }
 0x12c   :  { %v2005_v63 = vpop.f32.mrb[4].mxu1 }
 0x12d   :  { %v2006_v0 = vpop.f32.mrb[5].mxu1 }
 0x12e   :  { %v2007_v1 = vadd.f32 %v2006_v0, %v2005_v63  ;;  %v2008_v2 = vpop.f32.mrb[6].mxu1 }
 0x12f   :  { %v2009_v3 = vpop.f32.mrb[7].mxu1 }
 0x130   :  { %v1295_v4 = vadd.f32 %v2007_v1, %v1255_v62  ;;  %v1958_v62 = vld [vmem:[%s2623_s6] ss:$0 sm:$0xff] }
 0x14c   :  { %v2027_v5 = vpop.f32.mrb[8].mxu1 }
 0x14d   :  { %v2028_v6 = vpop.f32.mrb[9].mxu1 }
 0x14e   :  { %v2029_v7 = vadd.f32 %v2028_v6, %v2027_v5  ;;  %v2030_v8 = vpop.f32.mrb[10].mxu1 }
 0x14f   :  { %v2031_v9 = vpop.f32.mrb[11].mxu1 }
 0x150   :  { %v1335_v10 = vadd.f32 %v2029_v7, %v1295_v4 }
 0x154   :  { %v1374_v11 = vpop.f32.mrb[12].mxu1 }
 0x155   :  { %v1375_v12 = vadd.f32 %v1374_v11, %v1335_v10  ;;  %v2079_v13 = vpop.f32.mrb[13].mxu1 }
 0x156   :  { %v1377_v14 = vpop.f32.mrb[14].mxu1 }
 0x157   :  { %v2080_v15 = vpop.f32.mrb[15].mxu1  ;;  %v1382_v38 = vmax.f32 %v1375_v12, 0.0 }
 0x159   :  { %v1385_v39 = vpack.c.bf16 %v1382_v38, %v1382_v38 }
 0x1b2   :  { %v1213_v20 = vpop.f32.mrb[0].mxu0 }
 0x1b3   :  { %v2121_v21 = vadd.f32 %v1213_v20, %v256_v18  ;;  %v1215_v22 = vpop.f32.mrb[1].mxu0 }
 0x1b4   :  { %v2122_v23 = vadd.f32 %v1215_v22, %v260_v19  ;;  %v1217_v24 = vpop.f32.mrb[2].mxu0 }
 0x1b5   :  { %v1380_v25 = vmax.f32 %v2121_v21, 0.0  ;;  %v1218_v26 = vpop.f32.mrb[3].mxu0 }
 0x1b6   :  { %v1381_v27 = vmax.f32 %v2122_v23, 0.0 }
 0x1b7   :  { %v1383_v30 = vpack.c.bf16 %v1380_v25, %v1380_v25 }
 0x1b8   :  { %v1384_v28 = vpack.c.bf16 %v1381_v27, %v1381_v27 }
 0x1ba   :  { %1617 = vmatprep.mubr.bf16.mxu1 %v1384_v28 }
 0x1bb   :  { %1618 = vmatmul.mubr.bf16.vlgmr.msra.gmra.mrb[16].mxu1 %v1383_v30 }
 0x1bc   :  { %2082 = vmatpush3.bf16.msra.mxu1 %v2353_v29  ;;  %2097 = vmatprep.mubr.msk.bf16.mxu1 %vm2397_vm1, %v2396_v61 }
 0x1bd   :  { %2083 = vmatprep.subr.bf16.mxu1 %v2396_v61 }
 0x1c0   :  { %2084 = vmatpush3.bf16.msra.mxu1 %v2354_v31 }
 0x1c1   :  { %2085 = vmatprep.subr.bf16.mxu1 %v2396_v61 }
 0x1c4   :  { %2086 = vmatpush3.bf16.msra.mxu1 %v2355_v32 }
 0x1c5   :  { %2087 = vmatprep.subr.bf16.mxu1 %v2396_v61 }
 0x1c8   :  { %2088 = vmatpush3.bf16.msra.mxu1 %v2356_v33 }
 0x1c9   :  { %2089 = vmatprep.subr.bf16.mxu1 %v2396_v61 }
 0x1cc   :  { %2090 = vmatpush3.bf16.msra.mxu1 %v2357_v34 }
 0x1cd   :  { %2091 = vmatprep.subr.bf16.mxu1 %v2396_v61 }
 0x1d0   :  { %2092 = vmatpush3.bf16.msra.mxu1 %v2358_v35 }
 0x1d1   :  { %2093 = vmatprep.subr.bf16.mxu1 %v2396_v61 }
 0x1d4   :  { %2094 = vmatpush3.bf16.msra.mxu1 %v2359_v36 }
 0x1d5   :  { %2095 = vmatprep.subr.bf16.mxu1 %v2396_v61 }
 0x1d8   :  { %2096 = vmatpush3.bf16.msra.mxu1 %v2360_v37 }
 0x1d9   :  { %2101 = vmatprep.subr.bf16.mxu1 %v2396_v61 }
 0x1db   :  { %2098 = vmatmul.mubr.bf16.vlgmr.msra.gmra.mrb[20].mxu1 %v1385_v39 }
 0x1dc   :  { %2117 = vmatprep.mubr.msk.bf16.mxu1 %vm2397_vm1, %v2396_v61  ;;  %2102 = vmatpush3.bf16.msra.mxu1 %v2361_v40 }
 0x1dd   :  { %2103 = vmatprep.subr.bf16.mxu1 %v2396_v61 }
 0x1e0   :  { %2104 = vmatpush3.bf16.msra.mxu1 %v2362_v41 }
 0x1e1   :  { %2105 = vmatprep.subr.bf16.mxu1 %v2396_v61 }
 0x1e4   :  { %2106 = vmatpush3.bf16.msra.mxu1 %v2363_v42 }
 0x1e5   :  { %2107 = vmatprep.subr.bf16.mxu1 %v2396_v61 }
 0x1e8   :  { %2108 = vmatpush3.bf16.msra.mxu1 %v2364_v43 }
 0x1e9   :  { %2109 = vmatprep.subr.bf16.mxu1 %v2396_v61 }
 0x1ec   :  { %2110 = vmatpush3.bf16.msra.mxu1 %v2365_v44 }
 0x1ed   :  { %2111 = vmatprep.subr.bf16.mxu1 %v2396_v61 }
 0x1f0   :  { %2112 = vmatpush3.bf16.msra.mxu1 %v2366_v45 }
 0x1f1   :  { %2113 = vmatprep.subr.bf16.mxu1 %v2396_v61 }
 0x1f4   :  { %2114 = vmatpush3.bf16.msra.mxu1 %v2367_v46 }
 0x1f5   :  { %2115 = vmatprep.subr.bf16.mxu1 %v2396_v61 }
 0x1f8   :  { %2116 = vmatpush3.bf16.msra.mxu1 %v2368_v47 }
 0x28e   :  { %v2051_v48 = vpop.f32.mrb[16].mxu1 }
 0x28f   :  { %v2052_v49 = vpop.f32.mrb[17].mxu1 }
 0x290   :  { %v2053_v50 = vadd.f32 %v2052_v49, %v2051_v48  ;;  %v2054_v51 = vpop.f32.mrb[18].mxu1 }
 0x291   :  { %v2055_v52 = vpop.f32.mrb[19].mxu1 }
 0x292   :  { %v1620_v54 = vadd.f32 %v2053_v50, %v1933_v53 }
 0x2ae   :  { %v1659_v55 = vpop.f32.mrb[20].mxu1 }
 0x2af   :  { %v1660_v56 = vadd.f32 %v1659_v55, %v1620_v54  ;;  %v2099_v57 = vpop.f32.mrb[21].mxu1 }
 0x2b0   :  { %v1662_v58 = vpop.f32.mrb[22].mxu1 }
 0x2b1   :  { %v1665_v61 = vmax.f32 %v1660_v56, 0.0  ;;  %v2100_v59 = vpop.f32.mrb[23].mxu1 }
 0x2b3   :  { %v1666_v60 = vpack.c.bf16 %v1665_v61, %v1665_v61 }
 0x2b5   :  { %2118 = vmatmul.mubr.bf16.vlgmr.msra.gmra.mrb[24].mxu1 %v1666_v60 }
 0x388   :  { %v1772_v63 = vpop.f32.mrb[24].mxu1 }
 0x389   :  { %v1773_v0 = vadd.f32 %v1958_v62, %v1772_v63  ;;  %v2119_v1 = vpop.f32.mrb[25].mxu1 }
 0x38a   :  { %v1775_v2 = vpop.f32.mrb[26].mxu1 }
 0x38b   :  { %1778 = vst [vmem:[%s2624_s7] sm:$0xff] %v1773_v0  ;;  %v2120_v3 = vpop.f32.mrb[27].mxu1 }
 0x38c   :  { %1783 = vsyncpa [#allocation3], 1 }

</bundles_post_ra>
